<compile_context>
chip_gen: v5e
topology: v5e:2x2
jax: 0.10.0
libtpu: 0.0.40
codegen_flags: <defaults>
</compile_context>

<pallas_src>
import functools

import jax
import jax.numpy as jnp
from jax.experimental import pallas as pl
from jax.experimental.pallas import tpu as pltpu

LANES = 128


def _round_up(x, m):
    return ((x + m - 1) // m) * m


def _distance_loss_kernel(pred_ref, targ_r_ref, targ_p_ref, out_ref, acc_ref,
                          *, p, total_valid, tiles_per_split):
    t = pl.program_id(1)
    rt = pred_ref.shape[0]

    @pl.when(t == 0)
    def _():
        acc_ref[...] = jnp.zeros_like(acc_ref)

    pred = pred_ref[...].astype(jnp.float32)
    tr = targ_r_ref[...].astype(jnp.float32)
    tp = targ_p_ref[...]

    # sigmoid via one EUP transcendental: sigmoid(x) = 0.5*(tanh(x/2)+1)
    s = 0.5 * (jnp.tanh(0.5 * pred) + 1.0)
    loss_unweighted = jnp.abs(s - tr)

    # mask = 1 where tp > 0, p where tp == 0, 0 where tp < 0 (fused VPU selects)
    mask = jnp.where(tp > 0, jnp.float32(1.0),
                     jnp.where(tp == 0, jnp.float32(p), jnp.float32(0.0)))

    # Ragged-tail validity mask (replaces host-side padding).  Built from the
    # *unclamped* tile index so phantom / partial tiles are fully zeroed.
    # Element index fits int32 for any realistic loss tensor (< 2^31 elems).
    tile_idx = pl.program_id(0) * tiles_per_split + t
    row_ids = tile_idx * rt + jax.lax.broadcasted_iota(jnp.int32, (rt, LANES), 0)
    lane_ids = jax.lax.broadcasted_iota(jnp.int32, (rt, LANES), 1)
    valid = (row_ids * LANES + lane_ids) < total_valid

    # jnp.where (not a multiply) so garbage in the OOB part of a partial
    # block (possibly NaN) cannot contaminate the sum.
    contrib = jnp.where(valid, loss_unweighted * mask, jnp.float32(0.0))

    # Fold (row_tile, 128) -> (acc_rows, 128) with plain VPU adds into the
    # VMEM accumulator; no cross-lane (XLU) work in the hot loop.
    acc_rows = acc_ref.shape[0]
    acc_ref[...] += contrib.reshape(rt // acc_rows, acc_rows, LANES).sum(axis=0)

    @pl.when(t == pl.num_programs(1) - 1)
    def _():
        # One cross-lane/sublane reduce per split, written once.
        out_ref[0, 0] = jnp.sum(acc_ref[...])


def distance_loss(prediction_r, target_r, target_p, p=0.0001,
                  row_tile=2048, num_splits=2):
    """Pallas implementation of DistanceLoss.forward. Returns a scalar f32."""
    total = int(prediction_r.size)

    # Keep native dtypes (no f32 upcast pass over HBM); upcast in-kernel.
    pr = prediction_r.reshape(-1)
    tr = target_r.reshape(-1)
    tp = target_p.reshape(-1)

    # Lane-dense (rows, 128) slab.  Only when numel is not a multiple of 128
    # do we pad (<= 127 elements); the large num_splits*row_tile padding pass
    # of the previous version is gone — ragged tails are masked in-kernel.
    padded_total = _round_up(total, LANES)
    pad = padded_total - total
    if pad:
        pr = jnp.concatenate([pr, jnp.zeros((pad,), pr.dtype)])
        tr = jnp.concatenate([tr, jnp.zeros((pad,), tr.dtype)])
        tp = jnp.concatenate([tp, jnp.zeros((pad,), tp.dtype)])
    rows = padded_total // LANES

    pr = pr.reshape(rows, LANES)
    tr = tr.reshape(rows, LANES)
    tp = tp.reshape(rows, LANES)

    # Sublane multiple required by the narrowest streamed dtype.
    sub_mult = max(8, max(32 // x.dtype.itemsize for x in (pr, tr, tp)))

    if rows <= row_tile:
        row_tile = rows                       # full-extent block (always legal)
    else:
        row_tile = max(sub_mult, (row_tile // sub_mult) * sub_mult)

    tiles_total = pl.cdiv(rows, row_tile)
    num_splits = max(1, min(num_splits, tiles_total))
    tiles_per_split = pl.cdiv(tiles_total, num_splits)
    last_block = tiles_total - 1
    needs_clamp = (num_splits * tiles_per_split) != tiles_total

    # Accumulator fold width: 32 sublanes (4 independent VPU add chains) when
    # the tile allows it; degrade gracefully for tiny single-tile inputs.
    acc_rows = next((a for a in (32, 16, 8) if row_tile % a == 0), row_tile)

    def in_map(s, t):
        idx = s * tiles_per_split + t
        if needs_clamp:
            # Phantom tiles (uneven split) re-read the last real block; their
            # contribution is zeroed by the in-kernel element mask.
            idx = jnp.minimum(idx, last_block)
        return (idx, 0)

    tile_spec = pl.BlockSpec((row_tile, LANES), in_map)
    # NOTE: if a profile shows exposed DMA at tile boundaries, sweep
    # pipeline_mode=pl.Buffered(3) on the input specs (few-% win, +VMEM).

    kernel = functools.partial(_distance_loss_kernel, p=p, total_valid=total,
                               tiles_per_split=tiles_per_split)

    bytes_accessed = sum(int(x.size) * x.dtype.itemsize for x in (pr, tr, tp)) \
        + num_splits * 4

    partials = pl.pallas_call(
        kernel,
        out_shape=jax.ShapeDtypeStruct((num_splits, 1), jnp.float32),
        grid_spec=pltpu.PrefetchScalarGridSpec(
            num_scalar_prefetch=0,
            grid=(num_splits, tiles_per_split),
            in_specs=[tile_spec, tile_spec, tile_spec],
            out_specs=pl.BlockSpec((1, 1), lambda s, t: (s, 0),
                                   memory_space=pltpu.SMEM),
            scratch_shapes=[pltpu.VMEM((acc_rows, LANES), jnp.float32)],
        ),
        compiler_params=pltpu.CompilerParams(
            dimension_semantics=("parallel", "arbitrary"),
        ),
        cost_estimate=pl.CostEstimate(
            flops=10 * padded_total,
            transcendentals=padded_total,
            bytes_accessed=bytes_accessed,
        ),
    )(pr, tr, tp)

    # Final combine of the per-split partial sums + mean normalization.
    return jnp.sum(partials) / jnp.float32(total)


def _reference(prediction_r, target_r, target_p, p=0.0001):
    loss_unweighted = jnp.abs(jax.nn.sigmoid(prediction_r.astype(jnp.float32))
                              - target_r.astype(jnp.float32))
    mask = (target_p > 0).astype(jnp.float32) * 1.0 + \
           (target_p == 0).astype(jnp.float32) * p
    return jnp.mean(loss_unweighted * mask)


if __name__ == "__main__":
    key = jax.random.PRNGKey(0)

    def make(shape, k):
        k1, k2, k3 = jax.random.split(k, 3)
        pr = jax.random.normal(k1, shape, dtype=jnp.float32)
        tr = jax.random.uniform(k2, shape, dtype=jnp.float32)
        # target_p with a mix of positive, zero, and negative entries
        tp = jax.random.randint(k3, shape, minval=-1, maxval=2).astype(jnp.float32)
        return pr, tr, tp

    k0, k1, k2 = jax.random.split(key, 3)

    # Primary: NCHW dense-prediction style input (2048 elems, one full tile).
    pr, tr, tp = make((2, 4, 16, 16), k0)
    loss = distance_loss(pr, tr, tp, p=0.0001)
    jax.block_until_ready(loss)
    ref = _reference(pr, tr, tp, p=0.0001)
    assert jnp.allclose(loss, ref, atol=1e-5, rtol=1e-5), (loss, ref)

    # Ragged element count (not a multiple of 128) -> in-kernel tail mask.
    pr, tr, tp = make((2, 3, 10, 10), k1)
    loss2 = distance_loss(pr, tr, tp, p=0.0001)
    ref2 = _reference(pr, tr, tp, p=0.0001)
    assert jnp.allclose(loss2, ref2, atol=1e-5, rtol=1e-5), (loss2, ref2)

    # Multi-tile with an uneven split (phantom tile -> clamped index_map).
    pr, tr, tp = make((2, 4, 16, 24), k2)
    loss3 = distance_loss(pr, tr, tp, p=0.0001, row_tile=8, num_splits=2)
    ref3 = _reference(pr, tr, tp, p=0.0001)
    assert jnp.allclose(loss3, ref3, atol=1e-5, rtol=1e-5), (loss3, ref3)

    jax.block_until_ready(loss3)
    print("KERNEL_OK")
</pallas_src>

<mosaic_0001>
module attributes {stable_mosaic.version = 11 : i64} {
  func.func @_distance_loss_kernel(%arg0: i32, %arg1: i32, %arg2: memref<16x128xf32, #tpu.memory_space<vmem>>, %arg3: memref<16x128xf32, #tpu.memory_space<vmem>>, %arg4: memref<16x128xf32, #tpu.memory_space<vmem>>, %arg5: memref<1x1xf32, #tpu.memory_space<smem>>, %arg6: memref<16x128xf32, #tpu.memory_space<vmem>>) attributes {dimension_semantics = [#tpu.dimension_semantics<parallel>, #tpu.dimension_semantics<arbitrary>], iteration_bounds = array<i64: 1, 1>, scalar_prefetch = 0 : i64, scratch_operands = 1 : i64, tpu.core_type = #tpu.core_type<tc>, window_params = [{transform_indices = @transform_0, window_bounds = array<i64: 16, 128>}, {transform_indices = @transform_1, window_bounds = array<i64: 16, 128>}, {transform_indices = @transform_2, window_bounds = array<i64: 16, 128>}, {transform_indices = @transform_3, window_bounds = array<i64: 1, 1>}]} {
    %c0_i32 = arith.constant 0 : i32
    %0 = arith.cmpi eq, %arg1, %c0_i32 : i32
    %1 = arith.extui %0 : i1 to i32
    %c0_i32_0 = arith.constant 0 : i32
    %2 = arith.cmpi ne, %1, %c0_i32_0 : i32
    scf.if %2 {
      %cst_21 = arith.constant 0.000000e+00 : f32
      %47 = vector.broadcast %cst_21 : f32 to vector<16x128xf32>
      %c0_22 = arith.constant 0 : index
      %c0_23 = arith.constant 0 : index
      %48 = vector.load %arg6[%c0_22, %c0_23] : memref<16x128xf32, #tpu.memory_space<vmem>>, vector<16x128xf32>
      tpu.vector_store %arg6[%c0_22, %c0_23], %47 {strides = array<i32>} : memref<16x128xf32, #tpu.memory_space<vmem>>, vector<16x128xf32>,
    } else {
    }
    %c0 = arith.constant 0 : index
    %c0_1 = arith.constant 0 : index
    %3 = vector.load %arg2[%c0, %c0_1] : memref<16x128xf32, #tpu.memory_space<vmem>>, vector<16x128xf32>
    %c0_2 = arith.constant 0 : index
    %c0_3 = arith.constant 0 : index
    %4 = vector.load %arg3[%c0_2, %c0_3] : memref<16x128xf32, #tpu.memory_space<vmem>>, vector<16x128xf32>
    %c0_4 = arith.constant 0 : index
    %c0_5 = arith.constant 0 : index
    %5 = vector.load %arg4[%c0_4, %c0_5] : memref<16x128xf32, #tpu.memory_space<vmem>>, vector<16x128xf32>
    %cst = arith.constant 5.000000e-01 : f32
    %6 = vector.broadcast %cst : f32 to vector<16x128xf32>
    %7 = arith.mulf %6, %3 : vector<16x128xf32>
    %8 = math.tanh %7 : vector<16x128xf32>
    %cst_6 = arith.constant 1.000000e+00 : f32
    %9 = vector.broadcast %cst_6 : f32 to vector<16x128xf32>
    %10 = arith.addf %8, %9 : vector<16x128xf32>
    %cst_7 = arith.constant 5.000000e-01 : f32
    %11 = vector.broadcast %cst_7 : f32 to vector<16x128xf32>
    %12 = arith.mulf %11, %10 : vector<16x128xf32>
    %13 = arith.subf %12, %4 : vector<16x128xf32>
    %14 = math.absf %13 : vector<16x128xf32>
    %cst_8 = arith.constant 0.000000e+00 : f32
    %15 = vector.broadcast %cst_8 : f32 to vector<16x128xf32>
    %16 = arith.cmpf ogt, %5, %15 : vector<16x128xf32>
    %cst_9 = arith.constant 0.000000e+00 : f32
    %17 = vector.broadcast %cst_9 : f32 to vector<16x128xf32>
    %18 = arith.cmpf oeq, %5, %17 : vector<16x128xf32>
    %cst_10 = arith.constant 9.99999974E-5 : f32
    %cst_11 = arith.constant 0.000000e+00 : f32
    %19 = vector.broadcast %cst_10 : f32 to vector<16x128xf32>
    %20 = vector.broadcast %cst_11 : f32 to vector<16x128xf32>
    %21 = arith.select %18, %19, %20 : vector<16x128xi1>, vector<16x128xf32>
    %cst_12 = arith.constant 1.000000e+00 : f32
    %22 = vector.broadcast %cst_12 : f32 to vector<16x128xf32>
    %23 = arith.select %16, %22, %21 : vector<16x128xi1>, vector<16x128xf32>
    %c1_i32 = arith.constant 1 : i32
    %24 = arith.muli %arg0, %c1_i32 : i32
    %25 = arith.addi %24, %arg1 : i32
    %c16_i32 = arith.constant 16 : i32
    %26 = arith.muli %25, %c16_i32 : i32
    %27 = tpu.iota {dimensions = array<i32: 0>} : vector<16x128xi32>
    %28 = vector.broadcast %26 : i32 to vector<16x128xi32>
    %29 = arith.addi %28, %27 : vector<16x128xi32>
    %30 = tpu.iota {dimensions = array<i32: 1>} : vector<16x128xi32>
    %c128_i32 = arith.constant 128 : i32
    %31 = vector.broadcast %c128_i32 : i32 to vector<16x128xi32>
    %32 = arith.muli %29, %31 : vector<16x128xi32>
    %33 = arith.addi %32, %30 : vector<16x128xi32>
    %c2048_i32 = arith.constant 2048 : i32
    %34 = vector.broadcast %c2048_i32 : i32 to vector<16x128xi32>
    %35 = arith.cmpi slt, %33, %34 : vector<16x128xi32>
    %36 = arith.mulf %14, %23 : vector<16x128xf32>
    %cst_13 = arith.constant 0.000000e+00 : f32
    %37 = vector.broadcast %cst_13 : f32 to vector<16x128xf32>
    %38 = arith.select %35, %36, %37 : vector<16x128xi1>, vector<16x128xf32>
    %c0_14 = arith.constant 0 : index
    %c0_15 = arith.constant 0 : index
    %39 = vector.load %arg6[%c0_14, %c0_15] : memref<16x128xf32, #tpu.memory_space<vmem>>, vector<16x128xf32>
    %40 = vector.shape_cast %38 : vector<16x128xf32> to vector<1x16x128xf32>
    %cst_16 = arith.constant dense<0.000000e+00> : vector<16x128xf32>
    %41 = vector.multi_reduction <add>, %40, %cst_16 [0] : vector<1x16x128xf32> to vector<16x128xf32>
    %42 = arith.addf %39, %41 : vector<16x128xf32>
    %c0_17 = arith.constant 0 : index
    %c0_18 = arith.constant 0 : index
    %43 = vector.load %arg6[%c0_17, %c0_18] : memref<16x128xf32, #tpu.memory_space<vmem>>, vector<16x128xf32>
    tpu.vector_store %arg6[%c0_17, %c0_18], %42 {strides = array<i32>} : memref<16x128xf32, #tpu.memory_space<vmem>>, vector<16x128xf32>,
    %c0_i32_19 = arith.constant 0 : i32
    %44 = arith.cmpi eq, %arg1, %c0_i32_19 : i32
    %45 = arith.extui %44 : i1 to i32
    %c0_i32_20 = arith.constant 0 : i32
    %46 = arith.cmpi ne, %45, %c0_i32_20 : i32
    scf.if %46 {
      %c0_21 = arith.constant 0 : index
      %c0_22 = arith.constant 0 : index
      %47 = vector.load %arg6[%c0_21, %c0_22] : memref<16x128xf32, #tpu.memory_space<vmem>>, vector<16x128xf32>
      %48 = vector.shape_cast %47 : vector<16x128xf32> to vector<1x16x128xf32>
      %cst_23 = arith.constant dense<0.000000e+00> : vector<1xf32>
      %49 = vector.multi_reduction <add>, %48, %cst_23 [1, 2] : vector<1x16x128xf32> to vector<1xf32>
      %50 = vector.shape_cast %49 : vector<1xf32> to vector<1x1x1xf32>
      %51 = vector.extract %50[0, 0, 0] : f32 from vector<1x1x1xf32>
      %c0_24 = arith.constant 0 : index
      %c0_25 = arith.constant 0 : index
      %52 = memref.load %arg5[%c0_24, %c0_25] : memref<1x1xf32, #tpu.memory_space<smem>>
      memref.store %51, %arg5[%c0_24, %c0_25] : memref<1x1xf32, #tpu.memory_space<smem>>
    } else {
    }
    return
  }
  func.func @transform_0(%arg0: i32, %arg1: i32) -> (i32, i32) {
    %c1_i32 = arith.constant 1 : i32
    %0 = arith.muli %arg0, %c1_i32 : i32
    %1 = arith.addi %0, %arg1 : i32
    %c0_i32 = arith.constant 0 : i32
    %c0_i32_0 = arith.constant 0 : i32
    return %1, %c0_i32 : i32, i32
  }
  func.func @transform_1(%arg0: i32, %arg1: i32) -> (i32, i32) {
    %c1_i32 = arith.constant 1 : i32
    %0 = arith.muli %arg0, %c1_i32 : i32
    %1 = arith.addi %0, %arg1 : i32
    %c0_i32 = arith.constant 0 : i32
    %c0_i32_0 = arith.constant 0 : i32
    return %1, %c0_i32 : i32, i32
  }
  func.func @transform_2(%arg0: i32, %arg1: i32) -> (i32, i32) {
    %c1_i32 = arith.constant 1 : i32
    %0 = arith.muli %arg0, %c1_i32 : i32
    %1 = arith.addi %0, %arg1 : i32
    %c0_i32 = arith.constant 0 : i32
    %c0_i32_0 = arith.constant 0 : i32
    return %1, %c0_i32 : i32, i32
  }
  func.func @transform_3(%arg0: i32, %arg1: i32) -> (i32, i32) {
    %c0_i32 = arith.constant 0 : i32
    %c0_i32_0 = arith.constant 0 : i32
    return %arg0, %c0_i32 : i32, i32
  }
}

</mosaic_0001>

<bundles_post_ra>
// kernel: tpu_custom_call.1
= control target key start
LH: loop header
LB: loop body
LE: loop exit
PB: predicated region body
PF: predicated region fallthrough
CT: control target
= control target key end

     0   :  { %8 = vsyncpa [#allocation4], 0  ;;  %s316_s0 = inlined_call_operand.hbm [shape: f32[16,128], index: 0, kind: input, shape index: {}]   ;;  %s317_s1 = inlined_call_operand.hbm [shape: f32[16,128], index: 1, kind: input, shape index: {}]   ;;  %s318_s2 = inlined_call_operand.hbm [shape: f32[16,128], index: 2, kind: input, shape index: {}]   ;;  %s319_s3 = inlined_call_operand.hbm [shape: f32[1,1], index: 3, kind: output, shape index: {}]  }
   0x1   :  { %9 = vsyncpa [#allocation7], 0 }
   0x2   :  { %10 = vsyncpa [#allocation5], 0  ;;  %s36_s14 = sshll.u32 %s317_s1, 4  ;;  %s277_s15 = smov [#allocation6]   ;;  %s37_s14 = int_to_ptr.hbm [resolvable:$true] %s36_s14 }
   0x3   :  { %s38_s16 = sshll.u32 %s277_s15, 4  ;;  %s19_s19 = sshll.u32 %s316_s0, 4  ;;  %s39_s16 = int_to_ptr.vmem [resolvable:$true] %s38_s16  ;;  %s20_s19 = int_to_ptr.hbm [resolvable:$true] %s19_s19 }
   0x4   :  { %s278_s20 = smov 128   ;;  %s279_s21 = smov 8  }
   0x5   :  { %44 = dma.hbm_to_vmem [thread:$0]  %s37_s14, 256, %s39_s16, [#allocation7], %s278_s20, %s278_s20, %s279_s21  }
   0x6   :  { %s280_s22 = smov [#allocation3]   ;;  %s53_s26 = sshll.u32 %s318_s2, 4  ;;  %s54_s26 = int_to_ptr.hbm [resolvable:$true] %s53_s26 }
   0x7   :  { %s21_s23 = sshll.u32 %s280_s22, 4  ;;  %s281_s1 = smov [#allocation8]   ;;  %s22_s23 = int_to_ptr.vmem [resolvable:$true] %s21_s23 }
   0x8   :  { %27 = dma.hbm_to_vmem [thread:$0]  %s20_s19, 256, %s22_s23, [#allocation4], %s278_s20, %s278_s20, %s279_s21  }
   0x9   :  { %s55_s27 = sshll.u32 %s281_s1, 4  ;;  %s56_s27 = int_to_ptr.vmem [resolvable:$true] %s55_s27 }
   0xa   :  { %61 = dma.hbm_to_vmem [thread:$0]  %s54_s26, 256, %s56_s27, [#allocation7], %s278_s20, %s278_s20, %s279_s21  }
   0xb   :  { %271 = dma.done.wait [#allocation4], 256  }
   0xc   :  { %272 = vsyncadd [#allocation4], 4294967040 }
   0xd   :  { %273 = dma.done.wait [#allocation7], 512  }
   0xe   :  { %274 = vsyncadd [#allocation7], 4294966784  ;;  %v114_v0 = vlaneseq  ;;  %v86_v1 = vld [vmem:[#allocation3] sm:$0xff]  ;;  %v87_v2 = vld [vmem:[#allocation3 + $0x8] sm:$0xff]  ;;  %v282_v19 = vmov 0.0   ;;  %s162_s28 = sshll.u32 %s319_s3, 4  ;;  %s163_s28 = int_to_ptr.hbm [resolvable:$true] %s162_s28 }
   0xf   :  { %v92_v3 = vmul.f32 0.5, %v86_v1  ;;  %v93_v4 = vmul.f32 0.5, %v87_v2  ;;  %v90_v6 = vld [vmem:[#allocation8] sm:$0xff]  ;;  %v91_v8 = vld [vmem:[#allocation8 + $0x8] sm:$0xff]  ;;  %v88_v15 = vld [vmem:[#allocation6] sm:$0xff]  ;;  %s283_s30 = smov [#allocation9]  }
  0x10   :  { %v115_v5 = vshrl.u32 %v114_v0, 7  ;;  %vm106_vm0 = vcmp.eq.f32.partialorder %v90_v6, 0.0  ;;  %v121_v10 = vand.u32 127, %v114_v0  ;;  %vm107_vm1 = vcmp.eq.f32.partialorder %v91_v8, 0.0  ;;  %v89_v17 = vld [vmem:[#allocation6 + $0x8] sm:$0xff] }
  0x11   :  { %183 = vtanh.f32 %v92_v3  ;;  %vm104_vm2 = vcmp.gt.f32.partialorder %v90_v6, 0.0  ;;  %v108_v20 = vsel %vm106_vm0, 0.0001, %v282_v19  ;;  %vm105_vm3 = vcmp.gt.f32.partialorder %v91_v8, 0.0 }
  0x12   :  { %185 = vtanh.f32 %v93_v4  ;;  %v116_v7 = vadd.s32 8, %v115_v5  ;;  %v122_v11 = vmul.u32 128, %v115_v5  ;;  %v109_v22 = vsel %vm107_vm1, 0.0001, %v282_v19 }
  0x13   :  { %v110_v27 = vsel %vm104_vm2, 1.0, %v108_v20  ;;  %v111_v29 = vsel %vm105_vm3, 1.0, %v109_v22 }
  0x14   :  { %v123_v14 = vmul.u32 128, %v116_v7  ;;  %v124_v23 = vadd.s32 %v122_v11, %v121_v10 }
  0x16   :  { %v125_v25 = vadd.s32 %v123_v14, %v121_v10  ;;  %vm126_vm4 = vcmp.lt.s32.totalorder %v124_v23, 2048 }
  0x17   :  { %v184_v9 = vpop.eup %183 }
  0x18   :  { %v186_v12 = vpop.eup %185  ;;  %v96_v13 = vadd.f32 1.0, %v184_v9  ;;  %vm127_vm5 = vcmp.lt.s32.totalorder %v125_v25, 2048 }
  0x19   :  { %v97_v16 = vadd.f32 1.0, %v186_v12 }
  0x1a   :  { %v98_v18 = vmul.f32 0.5, %v96_v13 }
  0x1b   :  { %v99_v21 = vmul.f32 0.5, %v97_v16 }
  0x1c   :  { %v100_v24 = vsub.f32 %v98_v18, %v88_v15 }
  0x1d   :  { %v101_v26 = vsub.f32 %v99_v21, %v89_v17 }
  0x1e   :  { %v102_v28 = vand.u32 2147483647, %v100_v24 }
  0x1f   :  { %v103_v30 = vand.u32 2147483647, %v101_v26 }
  0x20   :  { %v128_v31 = vmul.f32 %v110_v27, %v102_v28 }
  0x21   :  { %v129_v32 = vmul.f32 %v111_v29, %v103_v30 }
  0x22   :  { %v130_v33 = vsel %vm126_vm4, %v128_v31, 0.0 }
  0x23   :  { %v131_v34 = vsel %vm127_vm5, %v129_v32, 0.0 }
  0x24   :  { %v145_v35 = vadd.f32 %v131_v34, %v130_v33 }
  0x26   :  { %146 = vadd.xlane.f32.xlu0 %v145_v35 }
  0x99   :  { %v147_v36 = vpop.xlane.xlu0 %146 }
  0x9a   :  { %v148_v37 = vrot.slane %v147_v36, 4 }
  0x9c   :  { %v149_v38 = vadd.f32 %v148_v37, %v147_v36 }
  0x9e   :  { %v150_v39 = vrot.slane %v149_v38, 2 }
  0xa0   :  { %v151_v40 = vadd.f32 %v150_v39, %v149_v38 }
  0xa2   :  { %v152_v41 = vrot.slane %v151_v40, 1 }
  0xa4   :  { %v153_v42 = vadd.f32 %v152_v41, %v151_v40 }
  0xa6   :  { %174 = vpush %v153_v42 }
  0xd7   :  { %s175_s29 = spop %174 }
  0xd8   :  { %156 = sst [smem:[#allocation9]] %s175_s29 }
  0xd9   :  { %165 = dma.smem_to_hbm %s283_s30, 16, %s163_s28, [#allocation5]  }
  0xda   :  { %275 = dma.done.wait [#allocation5], 16  }
  0xdb   :  { %276 = vsyncadd [#allocation5], 4294967280 }
  0xdc   :  { %170 = sfence }
  0xdd   :  { %171 = vsyncpa [#allocation4], 1 }
  0xde   :  { %172 = vsyncpa [#allocation7], 1 }
  0xdf   :  { %173 = vsyncpa [#allocation5], 1 }

</bundles_post_ra>
